<compile_context>
chip_gen: v6e
topology: v6e:2x2x1
jax: 0.10.0
libtpu: 0.0.40
codegen_flags: <defaults>
</compile_context>

<pallas_src>
import jax
import jax.numpy as jnp
from jax.experimental import pallas as pl
from jax.experimental.pallas import tpu as pltpu

# ---- packed parameter slab layout (feature-major / PyTorch (out, in)) ------
SLAB_ROWS = 56        # 16 + 32 + 8 weight rows (50 live), multiple of 8
SLAB_COLS = 128       # one lane tile wide
BIAS_COL = 64         # biases live in a spare lane column as (out, 1) columns

LANE = 128            # TPU lane width
MAX_TB = 8192         # max batch tile (lanes); ~3 MiB of f32 activations/tile


def qnet_kernel(p_ref, x_ref, o_ref):
    """One batch tile.  x_ref: (8, TB) feature-major (rows 4..7 zero),
    o_ref: (8, TB) (rows 0..1 carry the two action probabilities)."""
    xT = x_ref[...]                                         # (8, TB)

    # ---- layer 1: Linear(4 -> 16) + ReLU (K padded to 8; w1 cols 4..7 zero)
    w1 = p_ref[0:16, 0:8]                                   # (16, 8)
    b1 = p_ref[0:16, BIAS_COL:BIAS_COL + 1]                 # (16, 1)
    h1 = jnp.maximum(
        jnp.dot(w1, xT, preferred_element_type=jnp.float32) + b1, 0.0)

    # ---- layer 2: Linear(16 -> 32) + ReLU
    w2 = p_ref[16:48, 0:16]                                 # (32, 16)
    b2 = p_ref[16:48, BIAS_COL:BIAS_COL + 1]                # (32, 1)
    h2 = jnp.maximum(
        jnp.dot(w2, h1, preferred_element_type=jnp.float32) + b2, 0.0)

    # ---- layer 3: Linear(32 -> 2) + sigmoid (M padded to 8; rows 2..7 zero)
    w3 = p_ref[48:56, 0:32]                                 # (8, 32)
    b3 = p_ref[48:56, BIAS_COL:BIAS_COL + 1]                # (8, 1)
    z = jnp.dot(w3, h2, preferred_element_type=jnp.float32) + b3

    # Exact sigmoid: exp rides the EUP slot; division cost is negligible and
    # keeps parity with the PyTorch reference.
    o_ref[...] = (1.0 / (1.0 + jnp.exp(-z))).astype(o_ref.dtype)


def _round_up(n, m):
    return ((n + m - 1) // m) * m


def _tile_and_pad(batch):
    """Pick the batch tile TB and padded batch B_pad (multiple of TB)."""
    b128 = _round_up(max(batch, 1), LANE)
    if b128 <= LANE:
        return LANE, LANE                       # small-batch fast path: 1 step
    # Big tiles (per-step overhead ~0.35us dominates the tiny DMAs), but keep
    # >= 2 grid steps so v7x can shard the batch across its two TensorCores.
    tb = max(LANE, min(MAX_TB, (b128 // 2) // LANE * LANE))
    return tb, _round_up(b128, tb)


def _qnet_pallas(xT, slab, tb):
    """Feature-major core.  xT: (8, B_pad) f32, rows 4..7 zero, B_pad % tb == 0.
    Returns (8, B_pad); rows 0..1 hold the two action probabilities."""
    B_pad = xT.shape[1]
    assert B_pad % tb == 0 and tb % LANE == 0
    return pl.pallas_call(
        qnet_kernel,
        out_shape=jax.ShapeDtypeStruct((8, B_pad), jnp.float32),
        grid_spec=pltpu.PrefetchScalarGridSpec(
            num_scalar_prefetch=0,
            grid=(B_pad // tb,),
            in_specs=[
                # Parameter slab: constant index map -> VMEM-resident, one DMA.
                pl.BlockSpec((SLAB_ROWS, SLAB_COLS), lambda i: (0, 0)),
                # Streamed batch tile of the feature-major input.
                pl.BlockSpec((8, tb), lambda i: (0, i)),
            ],
            out_specs=pl.BlockSpec((8, tb), lambda i: (0, i)),
        ),
        compiler_params=pltpu.CompilerParams(
            dimension_semantics=("parallel",)),   # shard tiles over v7x's 2 TCs
    )(slab, xT)


@jax.jit
def qnet_forward(x, slab):
    """Batch-major convenience wrapper: x (B, 4) f32 -> (B, 2) probabilities."""
    B, F = x.shape
    tb, B_pad = _tile_and_pad(B)
    # Feature-major, zero-padded to 8 feature rows and B_pad batch lanes.
    xT = jnp.pad(x.T.astype(jnp.float32), ((0, 8 - F), (0, B_pad - B)))
    outT = _qnet_pallas(xT, slab, tb)
    return outT[:2, :B].T                                   # back to (B, 2)


def init_params(key):
    """nn.Linear-style U(-1/sqrt(fan_in), 1/sqrt(fan_in)); weights (out, in)."""
    dims = [(4, 16), (16, 32), (32, 2)]
    params = []
    for i, (fan_in, fan_out) in enumerate(dims):
        kw, kb = jax.random.split(jax.random.fold_in(key, i))
        bound = 1.0 / jnp.sqrt(float(fan_in))
        w = jax.random.uniform(kw, (fan_out, fan_in), jnp.float32, -bound, bound)
        b = jax.random.uniform(kb, (fan_out,), jnp.float32, -bound, bound)
        params += [w, b]
    return tuple(params)


def pack_params(params):
    """Pack all weights/biases into one zero-initialized (56, 128) f32 slab."""
    w1, b1, w2, b2, w3, b3 = params
    slab = jnp.zeros((SLAB_ROWS, SLAB_COLS), jnp.float32)
    slab = slab.at[0:16, 0:4].set(w1)
    slab = slab.at[0:16, BIAS_COL].set(b1)
    slab = slab.at[16:48, 0:16].set(w2)
    slab = slab.at[16:48, BIAS_COL].set(b2)
    slab = slab.at[48:50, 0:32].set(w3)
    slab = slab.at[48:50, BIAS_COL].set(b3)
    return slab


def qnet_reference(x, params):
    """Ground-truth f32 forward (matches the PyTorch module)."""
    w1, b1, w2, b2, w3, b3 = params
    hp = jax.lax.Precision.HIGHEST
    h1 = jnp.maximum(jnp.dot(x, w1.T, precision=hp) + b1, 0.0)
    h2 = jnp.maximum(jnp.dot(h1, w2.T, precision=hp) + b2, 0.0)
    return jax.nn.sigmoid(jnp.dot(h2, w3.T, precision=hp) + b3)


if __name__ == "__main__":
    key = jax.random.PRNGKey(0)
    params = init_params(key)
    slab = pack_params(params)

    # Small batch (single-tile fast path) and a multi-tile / multi-step batch.
    for B in (8, 384):
        x = jax.random.normal(jax.random.fold_in(key, 100 + B), (B, 4),
                              jnp.float32)
        out = jax.block_until_ready(qnet_forward(x, slab))
        ref = qnet_reference(x, params)
        assert out.shape == (B, 2), out.shape
        assert bool(jnp.all(jnp.isfinite(out)))
        assert jnp.allclose(out, ref, atol=5e-3, rtol=1e-3), (
            f"mismatch at B={B}: max|diff|="
            f"{float(jnp.max(jnp.abs(out - ref)))}")

    print("KERNEL_OK")
</pallas_src>

<mosaic_0001>
module attributes {stable_mosaic.version = 11 : i64} {
  func.func @qnet_kernel(%arg0: i32, %arg1: memref<56x128xf32, #tpu.memory_space<vmem>>, %arg2: memref<8x128xf32, #tpu.memory_space<vmem>>, %arg3: memref<8x128xf32, #tpu.memory_space<vmem>>) attributes {dimension_semantics = [#tpu.dimension_semantics<parallel>], iteration_bounds = array<i64: 1>, scalar_prefetch = 0 : i64, scratch_operands = 0 : i64, tpu.core_type = #tpu.core_type<tc>, window_params = [{pipeline_mode = #tpu.pipeline_mode<synchronous>, transform_indices = @transform_0, window_bounds = array<i64: 56, 128>}, {transform_indices = @transform_1, window_bounds = array<i64: 8, 128>}, {transform_indices = @transform_2, window_bounds = array<i64: 8, 128>}]} {
    %c0 = arith.constant 0 : index
    %c0_0 = arith.constant 0 : index
    %0 = vector.load %arg2[%c0, %c0_0] : memref<8x128xf32, #tpu.memory_space<vmem>>, vector<8x128xf32>
    %c0_1 = arith.constant 0 : index
    %c0_2 = arith.constant 0 : index
    %1 = vector.load %arg1[%c0_1, %c0_2] : memref<56x128xf32, #tpu.memory_space<vmem>>, vector<16x8xf32>
    %c0_3 = arith.constant 0 : index
    %c64 = arith.constant 64 : index
    %2 = vector.load %arg1[%c0_3, %c64] : memref<56x128xf32, #tpu.memory_space<vmem>>, vector<16x1xf32>
    %cst = arith.constant dense<0.000000e+00> : vector<16x128xf32>
    %3 = tpu.matmul %1, %0, %cst {dimension_numbers = #tpu.dot_dimension_numbers<[1], [0], [0], [1], [0, 0, 1, 1], [], []>} : vector<16x8xf32>, vector<8x128xf32>, vector<16x128xf32> -> vector<16x128xf32>
    %4 = vector.broadcast %2 : vector<16x1xf32> to vector<16x128xf32>
    %5 = arith.addf %3, %4 : vector<16x128xf32>
    %cst_4 = arith.constant 0.000000e+00 : f32
    %6 = vector.broadcast %cst_4 : f32 to vector<16x128xf32>
    %7 = arith.maximumf %5, %6 : vector<16x128xf32>
    %c16 = arith.constant 16 : index
    %c0_5 = arith.constant 0 : index
    %8 = vector.load %arg1[%c16, %c0_5] : memref<56x128xf32, #tpu.memory_space<vmem>>, vector<32x16xf32>
    %c16_6 = arith.constant 16 : index
    %c64_7 = arith.constant 64 : index
    %9 = vector.load %arg1[%c16_6, %c64_7] : memref<56x128xf32, #tpu.memory_space<vmem>>, vector<32x1xf32>
    %cst_8 = arith.constant dense<0.000000e+00> : vector<32x128xf32>
    %10 = tpu.matmul %8, %7, %cst_8 {dimension_numbers = #tpu.dot_dimension_numbers<[1], [0], [0], [1], [0, 0, 1, 1], [], []>} : vector<32x16xf32>, vector<16x128xf32>, vector<32x128xf32> -> vector<32x128xf32>
    %11 = vector.broadcast %9 : vector<32x1xf32> to vector<32x128xf32>
    %12 = arith.addf %10, %11 : vector<32x128xf32>
    %cst_9 = arith.constant 0.000000e+00 : f32
    %13 = vector.broadcast %cst_9 : f32 to vector<32x128xf32>
    %14 = arith.maximumf %12, %13 : vector<32x128xf32>
    %c48 = arith.constant 48 : index
    %c0_10 = arith.constant 0 : index
    %15 = vector.load %arg1[%c48, %c0_10] : memref<56x128xf32, #tpu.memory_space<vmem>>, vector<8x32xf32>
    %c48_11 = arith.constant 48 : index
    %c64_12 = arith.constant 64 : index
    %16 = vector.load %arg1[%c48_11, %c64_12] : memref<56x128xf32, #tpu.memory_space<vmem>>, vector<8x1xf32>
    %cst_13 = arith.constant dense<0.000000e+00> : vector<8x128xf32>
    %17 = tpu.matmul %15, %14, %cst_13 {dimension_numbers = #tpu.dot_dimension_numbers<[1], [0], [0], [1], [0, 0, 1, 1], [], []>} : vector<8x32xf32>, vector<32x128xf32>, vector<8x128xf32> -> vector<8x128xf32>
    %18 = vector.broadcast %16 : vector<8x1xf32> to vector<8x128xf32>
    %19 = arith.addf %17, %18 : vector<8x128xf32>
    %cst_14 = arith.constant 0.000000e+00 : f32
    %20 = vector.broadcast %cst_14 : f32 to vector<8x128xf32>
    %21 = arith.subf %20, %19 : vector<8x128xf32>
    %22 = math.exp %21 : vector<8x128xf32>
    %cst_15 = arith.constant 1.000000e+00 : f32
    %23 = vector.broadcast %cst_15 : f32 to vector<8x128xf32>
    %24 = arith.addf %23, %22 : vector<8x128xf32>
    %cst_16 = arith.constant 1.000000e+00 : f32
    %25 = vector.broadcast %cst_16 : f32 to vector<8x128xf32>
    %26 = arith.divf %25, %24 : vector<8x128xf32>
    %c0_17 = arith.constant 0 : index
    %c0_18 = arith.constant 0 : index
    %27 = vector.load %arg3[%c0_17, %c0_18] : memref<8x128xf32, #tpu.memory_space<vmem>>, vector<8x128xf32>
    tpu.vector_store %arg3[%c0_17, %c0_18], %26 {strides = array<i32>} : memref<8x128xf32, #tpu.memory_space<vmem>>, vector<8x128xf32>,
    return
  }
  func.func @transform_0(%arg0: i32) -> (i32, i32) {
    %c0_i32 = arith.constant 0 : i32
    %c0_i32_0 = arith.constant 0 : i32
    %c0_i32_1 = arith.constant 0 : i32
    return %c0_i32, %c0_i32_0 : i32, i32
  }
  func.func @transform_1(%arg0: i32) -> (i32, i32) {
    %c0_i32 = arith.constant 0 : i32
    %c0_i32_0 = arith.constant 0 : i32
    return %c0_i32, %arg0 : i32, i32
  }
  func.func @transform_2(%arg0: i32) -> (i32, i32) {
    %c0_i32 = arith.constant 0 : i32
    %c0_i32_0 = arith.constant 0 : i32
    return %c0_i32, %arg0 : i32, i32
  }
}

</mosaic_0001>

<bundles_post_ra>
// kernel: qnet_forward.1
= control target key start
LH: loop header
LB: loop body
LE: loop exit
PB: predicated region body
PF: predicated region fallthrough
CT: control target
= control target key end

     0   :  { %7 = vsyncpa [#allocation3], 0  ;;  %s414_s9 = smov [#allocation2]   ;;  %s448_s0 = inlined_call_operand.hbm [shape: f32[56,128], index: 0, kind: input, shape index: {}]   ;;  %s449_s1 = inlined_call_operand.vmem [shape: f32[8,128], index: 1, kind: input, shape index: {}]   ;;  %s450_s2 = inlined_call_operand.vmem [shape: f32[8,128], index: 2, kind: output, shape index: {}]  }
   0x1   :  { %s13_s10 = sshll.u32 %s414_s9, 4  ;;  %s14_s10 = int_to_ptr.vmem [resolvable:$true] %s13_s10 }
   0x2   :  { %s400_s11 = scalar_lea.vmem %s14_s10, 896  ;;  %p405_p1 = scmp.lt.s32.totalorder %s14_s10, %s14_s10 }
   0x3   :  { %p401_p0 = scmp.ne.s32.totalorder %s14_s10, %s400_s11  ;;  %p406_p2 = scmp.lt.s32.totalorder %s400_s11, %s400_s11 }
   0x5   :  { %p407_p3 = por %p406_p2, %p405_p1 }
   0x7   :  { %p408_p4 = pnand %p407_p3, %p401_p0 }
   0x9   :  { %411 = shalt.err (!%p408_p4)
}
   0xa   :  { %s415_s12 = smov 128   ;;  %s416_s13 = smov 8  }
   0xb   :  { %19 = dma.hbm_to_vmem [thread:$0]  %s448_s0, 896, %s14_s10, [#allocation3], %s415_s12, %s415_s12, %s416_s13  }
   0xc   :  { %412 = dma.done.wait [#allocation3], 896  }
   0xd   :  { %413 = vsyncadd [#allocation3], 4294966400  ;;  %v417_v0 = vmov 64   ;;  %vm38_vm0 = vcmask 64512   ;;  %v25_v1 = vld [vmem:[%s449_s1] sm:$0xff]  ;;  %v27_v3 = vld [vmem:[#allocation2 + $0x8] sm:$0xff] }
   0xe   :  { %386 = vset.pattern.permute.xlu0 %v417_v0  ;;  %387 = vset.pattern.permute.xlu1 %v417_v0  ;;  %v26_v2 = vld [vmem:[#allocation2] sm:$0xff]  ;;  %v121_v4 = vld [vmem:[#allocation2 + $0x18] sm:$0xff]  ;;  %v242_v5 = vld [vmem:[#allocation2 + $0x30] sm:$0xff]  ;;  %vm144_vm1 = vcmask 130048   ;;  %v418_v17 = vmov 0.0   ;;  %vm419_vm2 = vmmov 0  }
   0xf   :  { %354 = vmatprep.subr.mxu0 %v25_v1  ;;  %356 = vmatprep.mubr.msk.f32.mxu0 %vm38_vm0, %v26_v2  ;;  %v120_v6 = vld [vmem:[#allocation2 + $0x10] sm:$0xff]  ;;  %v123_v7 = vld [vmem:[#allocation2 + $0x28] sm:$0xff]  ;;  %v122_v8 = vld [vmem:[#allocation2 + $0x20] sm:$0xff]  ;;  %vm248_vm3 = vcmask 261120  }
  0x10   :  { %355 = vmatpush3.msra.mxu0 %v25_v1  ;;  %35 = vperm.xlu0 %386, %v27_v3  }
  0x11   :  { %357 = vmatmul.mubr.msk.f32.vlgmr.msra.gmra.mxu0 %vm38_vm0, %v27_v3  ;;  %363 = vmatprep.mubr.msk.f32.mxu1 %vm144_vm1, %v120_v6 }
  0x12   :  { %141 = vperm.xlu1 %387, %v123_v7   ;;  %369 = vmatprep.subr.mxu0 %v418_v17 }
  0x13   :  { %377 = vmatprep.mubr.msk.f32.mxu0 %vm419_vm2, %v418_v17 }
  0x14   :  { %30 = vperm.xlu0 %386, %v26_v2  }
  0x16   :  { %136 = vperm.xlu1 %387, %v122_v8  }
  0x18   :  { %131 = vperm.xlu0 %386, %v121_v4  }
  0x1a   :  { %126 = vperm.xlu1 %387, %v120_v6  }
  0x1c   :  { %245 = vperm.xlu0 %386, %v242_v5  }
  0x8b   :  { %v36_v9 = vpop.permute.xlu0 %35 }
  0x8d   :  { %v142_v18 = vpop.permute.xlu1 %141 }
  0x8f   :  { %v31_v12 = vpop.permute.xlu0 %30 }
  0x91   :  { %v137_v19 = vpop.permute.xlu1 %136 }
  0x93   :  { %v132_v23 = vpop.permute.xlu0 %131 }
  0x95   :  { %v127_v25 = vpop.permute.xlu1 %126 }
  0x97   :  { %v246_v34 = vpop.permute.xlu0 %245 }
  0xd1   :  { %v358_v10 = vpop.f32.mrf.mxu0 }
  0xd2   :  { %v115_v11 = vadd.f32 %v358_v10, %v36_v9 }
  0xd3   :  { %v109_v13 = vpop.f32.mrf.mxu0 }
  0xd4   :  { %v119_v14 = vmax.f32 %v115_v11, 0.0  ;;  %v110_v15 = vadd.f32 %v109_v13, %v31_v12 }
  0xd6   :  { %v118_v16 = vmax.f32 %v110_v15, 0.0  ;;  %359 = vmatprep.subr.mxu1 %v119_v14 }
  0xd7   :  { %360 = vmatpush3.msra.mxu1 %v119_v14 }
  0xd8   :  { %361 = vmatprep.subr.mxu1 %v118_v16 }
  0xd9   :  { %362 = vmatpush3.msra.mxu1 %v118_v16 }
  0xda   :  { %364 = vmatmul.mubr.msk.f32.vlgmr.msra.gmra.mxu1 %vm144_vm1, %v121_v4 }
  0xdb   :  { %366 = vmatprep.mubr.msk.f32.mxu1 %vm144_vm1, %v122_v8 }
  0xde   :  { %367 = vmatmul.mubr.msk.f32.gmra.mxu1 %vm144_vm1, %v123_v7 }
 0x19a   :  { %v365_v20 = vpop.f32.mrf.mxu1 }
 0x19b   :  { %v225_v27 = vadd.f32 %v365_v20, %v132_v23 }
 0x19c   :  { %v219_v21 = vpop.f32.mrf.mxu1 }
 0x19d   :  { %v220_v30 = vadd.f32 %v219_v21, %v127_v25  ;;  %v239_v32 = vmax.f32 %v225_v27, 0.0 }
 0x19e   :  { %v368_v22 = vpop.f32.mrf.mxu1 }
 0x19f   :  { %v235_v24 = vadd.f32 %v368_v22, %v142_v18  ;;  %v238_v33 = vmax.f32 %v220_v30, 0.0 }
 0x1a0   :  { %v229_v26 = vpop.f32.mrf.mxu1 }
 0x1a1   :  { %v241_v28 = vmax.f32 %v235_v24, 0.0  ;;  %v230_v29 = vadd.f32 %v229_v26, %v137_v19 }
 0x1a3   :  { %v240_v31 = vmax.f32 %v230_v29, 0.0  ;;  %370 = vmatpush3.msra.mxu0 %v241_v28 }
 0x1a4   :  { %371 = vmatprep.subr.mxu0 %v418_v17 }
 0x1a5   :  { %372 = vmatpush3.msra.mxu0 %v240_v31 }
 0x1a6   :  { %373 = vmatprep.subr.mxu0 %v418_v17 }
 0x1a7   :  { %374 = vmatpush3.msra.mxu0 %v239_v32 }
 0x1a8   :  { %375 = vmatprep.subr.mxu0 %v418_v17 }
 0x1a9   :  { %376 = vmatpush3.msra.mxu0 %v238_v33 }
 0x1aa   :  { %378 = vmatmul.mubr.msk.f32.vlgmr.msra.gmra.mxu0 %vm248_vm3, %v242_v5 }
 0x26a   :  { %v317_v35 = vpop.f32.mrf.mxu0 }
 0x26b   :  { %v318_v36 = vadd.f32 %v317_v35, %v246_v34 }
 0x26c   :  { %v379_v37 = vpop.f32.mrf.mxu0 }
 0x26d   :  { %v321_v38 = vsub.f32 0.0, %v318_v36 }
 0x26f   :  { %v322_v39 = vmul.f32 1.442695, %v321_v38 }
 0x271   :  { %388 = vpow2.f32 %v322_v39 }
 0x27e   :  { %v389_v40 = vpop.eup %388 }
 0x27f   :  { %v324_v41 = vadd.f32 1.0, %v389_v40 }
 0x281   :  { %390 = vrcp.f32 %v324_v41 }
 0x28e   :  { %v391_v42 = vpop.eup %390 }
 0x28f   :  { %327 = vst [vmem:[%s450_s2] sm:$0xff] %v391_v42 }
 0x290   :  { %332 = vsyncpa [#allocation3], 1 }

</bundles_post_ra>
